<compile_context>
chip_gen: v7x
topology: tpu7x:2x2x1
jax: 0.10.0
libtpu: 0.0.40
codegen_flags: <defaults>
</compile_context>

<pallas_src>
import jax
import jax.numpy as jnp
from jax.experimental import pallas as pl
from jax.experimental.pallas import tpu as pltpu


def _mlp_kernel(xn_ref, feat_ref,
                wix_ref, wif_ref, bin_ref,
                w1_ref, b1_ref, w2_ref, b2_ref,
                wo_ref, bo_ref,
                out_ref):
    H = xn_ref.shape[0]
    pred_len = feat_ref.shape[0]

    # Hoist all loads out of the unrolled time loop.
    xn = xn_ref[...]          # (H, tm)   f32 rolling history window
    wix = wix_ref[...]        # (hid, H)  bf16   fc_in weight, history half
    wif = wif_ref[...]        # (hid, F)  bf16   fc_in weight, feature half
    w1 = w1_ref[...]          # (hid, hid) bf16
    w2 = w2_ref[...]          # (hid, hid) bf16
    wo = wo_ref[...]          # (1, hid)  bf16
    b_in = bin_ref[...]       # (hid, 1)  f32
    b1 = b1_ref[...]          # (hid, 1)  f32
    b2 = b2_ref[...]          # (hid, 1)  f32
    b_out = bo_ref[0]         # f32 scalar (SMEM)

    last_row = jax.lax.broadcasted_iota(jnp.int32, xn.shape, 0) == (H - 1)

    for i in range(pred_len):                       # static, fully unrolled
        feat_i = feat_ref[i]                        # (F, tm) bf16

        # fc_in : cat(xn, feat) @ W_in.T  ==  Wx @ xn + Wf @ feat   (W @ X form)
        x = (jnp.dot(wix, xn.astype(jnp.bfloat16),
                     preferred_element_type=jnp.float32)
             + jnp.dot(wif, feat_i, preferred_element_type=jnp.float32)
             + b_in)

        # mlp : Linear -> Sigmoid -> Linear -> Sigmoid  (element-wise in f32)
        h = jax.nn.sigmoid(
            jnp.dot(w1, x.astype(jnp.bfloat16),
                    preferred_element_type=jnp.float32) + b1)
        h = jax.nn.sigmoid(
            jnp.dot(w2, h.astype(jnp.bfloat16),
                    preferred_element_type=jnp.float32) + b2)

        # fc_out : (1, hid) @ (hid, tm) + b
        pred = jnp.dot(wo, h.astype(jnp.bfloat16),
                       preferred_element_type=jnp.float32) + b_out   # (1, tm)

        # lane-dense row store into the VMEM-resident output slab
        out_ref[pl.ds(i, 1), :] = pred.astype(out_ref.dtype)

        if i + 1 < pred_len:
            # sliding window along sublanes: xn <- [xn[1:], pred]
            rolled = pltpu.roll(xn, H - 1, axis=0)   # rolled[h] = xn[(h+1) % H]
            xn = jnp.where(last_row, pred, rolled)


def _pick_m_tile(M):
    """Lane tile for the flattened B*N axis (multiple of 128, or full M)."""
    if M % 128 != 0:
        return M
    for tm in (2048, 1024, 512, 256, 128):
        if M % tm == 0:
            return tm
    return M


def mlp_forward_pallas(pm25_hist, feature, time_feature, params, hist_len, pred_len):
    del time_feature  # unused by the reference forward (kept for signature parity)
    w_in, b_in, w1, b1, w2, b2, w_out, b_out = params

    B = pm25_hist.shape[0]
    N = pm25_hist.shape[2]
    # Same raw row-major reshape as torch: (B, hist_len, N, 1) -> (B, N, hist_len).
    xn0 = jnp.reshape(pm25_hist, (B, N, -1)).astype(jnp.float32)
    H = xn0.shape[-1]
    M = B * N
    xn0 = jnp.transpose(xn0.reshape(M, H))                          # (H, M)

    F = feature.shape[-1]
    feat = feature[:, hist_len:hist_len + pred_len]                 # (B, P, N, F)
    feat = jnp.transpose(feat, (1, 3, 0, 2)).reshape(pred_len, F, M)  # (P, F, M)
    feat = feat.astype(jnp.bfloat16)

    hid = w1.shape[0]
    wix = w_in[:, :H].astype(jnp.bfloat16)                          # (hid, H)
    wif = w_in[:, H:].astype(jnp.bfloat16)                          # (hid, F)
    w1b = w1.astype(jnp.bfloat16)
    w2b = w2.astype(jnp.bfloat16)
    wo = w_out.astype(jnp.bfloat16)                                 # (1, hid)
    bin_ = b_in.reshape(hid, 1).astype(jnp.float32)
    b1_ = b1.reshape(hid, 1).astype(jnp.float32)
    b2_ = b2.reshape(hid, 1).astype(jnp.float32)
    bo = b_out.reshape(1).astype(jnp.float32)                       # SMEM scalar

    tm = _pick_m_tile(M)
    grid = (M // tm,)

    def full_spec(shape):
        nd = len(shape)
        return pl.BlockSpec(shape, lambda m, _nd=nd: (0,) * _nd)

    in_specs = [
        pl.BlockSpec((H, tm), lambda m: (0, m)),                    # xn0
        pl.BlockSpec((pred_len, F, tm), lambda m: (0, 0, m)),       # all-step features
        full_spec((hid, H)), full_spec((hid, F)), full_spec((hid, 1)),   # fc_in
        full_spec((hid, hid)), full_spec((hid, 1)),                      # mlp[0]
        full_spec((hid, hid)), full_spec((hid, 1)),                      # mlp[2]
        full_spec((1, hid)),                                             # fc_out W
        pl.BlockSpec(memory_space=pltpu.MemorySpace.SMEM),               # fc_out b
    ]
    out_spec = pl.BlockSpec((pred_len, tm), lambda m: (0, m))

    out = pl.pallas_call(
        _mlp_kernel,
        grid=grid,
        in_specs=in_specs,
        out_specs=out_spec,
        out_shape=jax.ShapeDtypeStruct((pred_len, M), jnp.float32),
        compiler_params=pltpu.CompilerParams(
            dimension_semantics=("parallel",)),
    )(xn0, feat, wix, wif, bin_, w1b, b1_, w2b, b2_, wo, bo)

    # (pred_len, M) -> (B, pred_len, N, 1)   (matches torch.stack(..., dim=1))
    out = jnp.transpose(out.reshape(pred_len, B, N), (1, 0, 2))
    return out[..., None]


def mlp_forward_ref(pm25_hist, feature, params, hist_len, pred_len):
    """Pure-JAX transcription of the PyTorch forward (for verification)."""
    w_in, b_in, w1, b1, w2, b2, w_out, b_out = params
    B, N = pm25_hist.shape[0], pm25_hist.shape[2]
    xn = jnp.reshape(pm25_hist, (B, N, -1)).astype(jnp.float32)
    preds = []
    for i in range(pred_len):
        x = jnp.concatenate([xn, feature[:, hist_len + i]], axis=-1)
        x = x @ w_in.T + b_in
        x = jax.nn.sigmoid(x @ w1.T + b1)
        x = jax.nn.sigmoid(x @ w2.T + b2)
        p = x @ w_out.T + b_out
        preds.append(p)
        xn = jnp.concatenate([xn[:, :, 1:], p], axis=-1)
    return jnp.stack(preds, axis=1)


if __name__ == "__main__":
    hist_len, pred_len = 8, 4
    B, N, F = 2, 64, 4          # M = B*N = 128 -> one full lane tile
    in_dim = hist_len + F       # cat(history_window, feature) along last dim
    hid = 16

    key = jax.random.PRNGKey(0)
    keys = jax.random.split(key, 11)

    pm25_hist = jax.random.normal(keys[0], (B, hist_len, N, 1), jnp.float32)
    feature = jax.random.normal(keys[1], (B, hist_len + pred_len, N, F), jnp.float32)
    time_feature = jax.random.normal(keys[2], (B, hist_len + pred_len, N, 2), jnp.float32)

    def linear_params(kw, kb, fan_out, fan_in):
        bound = 1.0 / (fan_in ** 0.5)
        w = jax.random.uniform(kw, (fan_out, fan_in), jnp.float32, -bound, bound)
        b = jax.random.uniform(kb, (fan_out,), jnp.float32, -bound, bound)
        return w, b

    w_in, b_in = linear_params(keys[3], keys[4], hid, in_dim)
    w1, b1 = linear_params(keys[5], keys[6], hid, hid)
    w2, b2 = linear_params(keys[7], keys[8], hid, hid)
    w_out, b_out = linear_params(keys[9], keys[10], 1, hid)
    params = (w_in, b_in, w1, b1, w2, b2, w_out, b_out)

    out = mlp_forward_pallas(pm25_hist, feature, time_feature, params,
                             hist_len, pred_len)
    out = jax.block_until_ready(out)

    ref = mlp_forward_ref(pm25_hist, feature, params, hist_len, pred_len)
    assert out.shape == (B, pred_len, N, 1), out.shape
    # Kernel matmuls run on the MXU in bf16 (f32 accumulation); reference is f32.
    assert jnp.allclose(out, ref, atol=2e-2, rtol=2e-2), (
        float(jnp.max(jnp.abs(out - ref))))

    print("KERNEL_OK")
</pallas_src>

<mosaic_0001>
module attributes {stable_mosaic.version = 11 : i64} {
  func.func @_mlp_kernel(%arg0: i32, %arg1: memref<8x128xf32, #tpu.memory_space<vmem>>, %arg2: memref<4x4x128xbf16, #tpu.memory_space<vmem>>, %arg3: memref<16x8xbf16, #tpu.memory_space<vmem>>, %arg4: memref<16x4xbf16, #tpu.memory_space<vmem>>, %arg5: memref<16x1xf32, #tpu.memory_space<vmem>>, %arg6: memref<16x16xbf16, #tpu.memory_space<vmem>>, %arg7: memref<16x1xf32, #tpu.memory_space<vmem>>, %arg8: memref<16x16xbf16, #tpu.memory_space<vmem>>, %arg9: memref<16x1xf32, #tpu.memory_space<vmem>>, %arg10: memref<1x16xbf16, #tpu.memory_space<vmem>>, %arg11: memref<1xf32, #tpu.memory_space<smem>>, %arg12: memref<4x128xf32, #tpu.memory_space<vmem>>) attributes {dimension_semantics = [#tpu.dimension_semantics<parallel>], iteration_bounds = array<i64: 1>, scalar_prefetch = 0 : i64, scratch_operands = 0 : i64, tpu.core_type = #tpu.core_type<tc>, window_params = [{transform_indices = @transform_0, window_bounds = array<i64: 8, 128>}, {transform_indices = @transform_1, window_bounds = array<i64: 4, 4, 128>}, {pipeline_mode = #tpu.pipeline_mode<synchronous>, transform_indices = @transform_2, window_bounds = array<i64: 16, 8>}, {pipeline_mode = #tpu.pipeline_mode<synchronous>, transform_indices = @transform_3, window_bounds = array<i64: 16, 4>}, {pipeline_mode = #tpu.pipeline_mode<synchronous>, transform_indices = @transform_4, window_bounds = array<i64: 16, 1>}, {pipeline_mode = #tpu.pipeline_mode<synchronous>, transform_indices = @transform_5, window_bounds = array<i64: 16, 16>}, {pipeline_mode = #tpu.pipeline_mode<synchronous>, transform_indices = @transform_6, window_bounds = array<i64: 16, 1>}, {pipeline_mode = #tpu.pipeline_mode<synchronous>, transform_indices = @transform_7, window_bounds = array<i64: 16, 16>}, {pipeline_mode = #tpu.pipeline_mode<synchronous>, transform_indices = @transform_8, window_bounds = array<i64: 16, 1>}, {pipeline_mode = #tpu.pipeline_mode<synchronous>, transform_indices = @transform_9, window_bounds = array<i64: 1, 16>}, {transform_indices = @transform_10, window_bounds = array<i64: 1>}, {transform_indices = @transform_11, window_bounds = array<i64: 4, 128>}]} {
    %c0 = arith.constant 0 : index
    %c0_0 = arith.constant 0 : index
    %0 = vector.load %arg1[%c0, %c0_0] : memref<8x128xf32, #tpu.memory_space<vmem>>, vector<8x128xf32>
    %c0_1 = arith.constant 0 : index
    %c0_2 = arith.constant 0 : index
    %1 = vector.load %arg3[%c0_1, %c0_2] : memref<16x8xbf16, #tpu.memory_space<vmem>>, vector<16x8xbf16>
    %c0_3 = arith.constant 0 : index
    %c0_4 = arith.constant 0 : index
    %2 = vector.load %arg4[%c0_3, %c0_4] : memref<16x4xbf16, #tpu.memory_space<vmem>>, vector<16x4xbf16>
    %c0_5 = arith.constant 0 : index
    %c0_6 = arith.constant 0 : index
    %3 = vector.load %arg6[%c0_5, %c0_6] : memref<16x16xbf16, #tpu.memory_space<vmem>>, vector<16x16xbf16>
    %c0_7 = arith.constant 0 : index
    %c0_8 = arith.constant 0 : index
    %4 = vector.load %arg8[%c0_7, %c0_8] : memref<16x16xbf16, #tpu.memory_space<vmem>>, vector<16x16xbf16>
    %c0_9 = arith.constant 0 : index
    %c0_10 = arith.constant 0 : index
    %5 = vector.load %arg10[%c0_9, %c0_10] : memref<1x16xbf16, #tpu.memory_space<vmem>>, vector<1x16xbf16>
    %c0_11 = arith.constant 0 : index
    %c0_12 = arith.constant 0 : index
    %6 = vector.load %arg5[%c0_11, %c0_12] : memref<16x1xf32, #tpu.memory_space<vmem>>, vector<16x1xf32>
    %c0_13 = arith.constant 0 : index
    %c0_14 = arith.constant 0 : index
    %7 = vector.load %arg7[%c0_13, %c0_14] : memref<16x1xf32, #tpu.memory_space<vmem>>, vector<16x1xf32>
    %c0_15 = arith.constant 0 : index
    %c0_16 = arith.constant 0 : index
    %8 = vector.load %arg9[%c0_15, %c0_16] : memref<16x1xf32, #tpu.memory_space<vmem>>, vector<16x1xf32>
    %c0_17 = arith.constant 0 : index
    %9 = memref.load %arg11[%c0_17] : memref<1xf32, #tpu.memory_space<smem>>
    %10 = tpu.iota {dimensions = array<i32: 0>} : vector<8x128xi32>
    %c7_i32 = arith.constant 7 : i32
    %11 = vector.broadcast %c7_i32 : i32 to vector<8x128xi32>
    %12 = arith.cmpi eq, %10, %11 : vector<8x128xi32>
    %c0_18 = arith.constant 0 : index
    %c0_19 = arith.constant 0 : index
    %c0_20 = arith.constant 0 : index
    %13 = vector.load %arg2[%c0_18, %c0_19, %c0_20] : memref<4x4x128xbf16, #tpu.memory_space<vmem>>, vector<1x4x128xbf16>
    %14 = vector.shape_cast %13 : vector<1x4x128xbf16> to vector<4x128xbf16>
    %15 = arith.truncf %0 : vector<8x128xf32> to vector<8x128xbf16>
    %cst = arith.constant dense<0.000000e+00> : vector<16x128xf32>
    %16 = tpu.matmul %1, %15, %cst {dimension_numbers = #tpu.dot_dimension_numbers<[1], [0], [0], [1], [0, 0, 1, 1], [], []>} : vector<16x8xbf16>, vector<8x128xbf16>, vector<16x128xf32> -> vector<16x128xf32>
    %cst_21 = arith.constant dense<0.000000e+00> : vector<16x128xf32>
    %17 = tpu.matmul %2, %14, %cst_21 {dimension_numbers = #tpu.dot_dimension_numbers<[1], [0], [0], [1], [0, 0, 1, 1], [], []>} : vector<16x4xbf16>, vector<4x128xbf16>, vector<16x128xf32> -> vector<16x128xf32>
    %18 = arith.addf %16, %17 : vector<16x128xf32>
    %19 = vector.broadcast %6 : vector<16x1xf32> to vector<16x128xf32>
    %20 = arith.addf %18, %19 : vector<16x128xf32>
    %21 = arith.truncf %20 : vector<16x128xf32> to vector<16x128xbf16>
    %cst_22 = arith.constant dense<0.000000e+00> : vector<16x128xf32>
    %22 = tpu.matmul %3, %21, %cst_22 {dimension_numbers = #tpu.dot_dimension_numbers<[1], [0], [0], [1], [0, 0, 1, 1], [], []>} : vector<16x16xbf16>, vector<16x128xbf16>, vector<16x128xf32> -> vector<16x128xf32>
    %23 = vector.broadcast %7 : vector<16x1xf32> to vector<16x128xf32>
    %24 = arith.addf %22, %23 : vector<16x128xf32>
    %25 = arith.negf %24 : vector<16x128xf32>
    %26 = math.exp %25 : vector<16x128xf32>
    %cst_23 = arith.constant 1.000000e+00 : f32
    %27 = vector.broadcast %cst_23 : f32 to vector<16x128xf32>
    %28 = arith.addf %27, %26 : vector<16x128xf32>
    %29 = arith.divf %27, %28 : vector<16x128xf32>
    %30 = arith.truncf %29 : vector<16x128xf32> to vector<16x128xbf16>
    %cst_24 = arith.constant dense<0.000000e+00> : vector<16x128xf32>
    %31 = tpu.matmul %4, %30, %cst_24 {dimension_numbers = #tpu.dot_dimension_numbers<[1], [0], [0], [1], [0, 0, 1, 1], [], []>} : vector<16x16xbf16>, vector<16x128xbf16>, vector<16x128xf32> -> vector<16x128xf32>
    %32 = vector.broadcast %8 : vector<16x1xf32> to vector<16x128xf32>
    %33 = arith.addf %31, %32 : vector<16x128xf32>
    %34 = arith.negf %33 : vector<16x128xf32>
    %35 = math.exp %34 : vector<16x128xf32>
    %cst_25 = arith.constant 1.000000e+00 : f32
    %36 = vector.broadcast %cst_25 : f32 to vector<16x128xf32>
    %37 = arith.addf %36, %35 : vector<16x128xf32>
    %38 = arith.divf %36, %37 : vector<16x128xf32>
    %39 = arith.truncf %38 : vector<16x128xf32> to vector<16x128xbf16>
    %cst_26 = arith.constant dense<0.000000e+00> : vector<1x128xf32>
    %40 = tpu.matmul %5, %39, %cst_26 {dimension_numbers = #tpu.dot_dimension_numbers<[1], [0], [0], [1], [0, 0, 1, 1], [], []>} : vector<1x16xbf16>, vector<16x128xbf16>, vector<1x128xf32> -> vector<1x128xf32>
    %41 = vector.broadcast %9 : f32 to vector<1x128xf32>
    %42 = arith.addf %40, %41 : vector<1x128xf32>
    %c0_27 = arith.constant 0 : index
    %c0_28 = arith.constant 0 : index
    %43 = vector.load %arg12[%c0_27, %c0_28] : memref<4x128xf32, #tpu.memory_space<vmem>>, vector<1x128xf32>
    tpu.vector_store %arg12[%c0_27, %c0_28], %42 {strides = array<i32>} : memref<4x128xf32, #tpu.memory_space<vmem>>, vector<1x128xf32>,
    %c7_i32_29 = arith.constant 7 : i32
    %44 = tpu.dynamic_rotate %0 by %c7_i32_29 dim 0 : vector<8x128xf32>, i32 -> vector<8x128xf32>
    %45 = vector.shape_cast %42 : vector<1x128xf32> to vector<1x128xf32>
    %46 = vector.broadcast %45 : vector<1x128xf32> to vector<8x128xf32>
    %47 = arith.select %12, %46, %44 : vector<8x128xi1>, vector<8x128xf32>
    %c1 = arith.constant 1 : index
    %c0_30 = arith.constant 0 : index
    %c0_31 = arith.constant 0 : index
    %48 = vector.load %arg2[%c1, %c0_30, %c0_31] : memref<4x4x128xbf16, #tpu.memory_space<vmem>>, vector<1x4x128xbf16>
    %49 = vector.shape_cast %48 : vector<1x4x128xbf16> to vector<4x128xbf16>
    %50 = arith.truncf %47 : vector<8x128xf32> to vector<8x128xbf16>
    %cst_32 = arith.constant dense<0.000000e+00> : vector<16x128xf32>
    %51 = tpu.matmul %1, %50, %cst_32 {dimension_numbers = #tpu.dot_dimension_numbers<[1], [0], [0], [1], [0, 0, 1, 1], [], []>} : vector<16x8xbf16>, vector<8x128xbf16>, vector<16x128xf32> -> vector<16x128xf32>
    %cst_33 = arith.constant dense<0.000000e+00> : vector<16x128xf32>
    %52 = tpu.matmul %2, %49, %cst_33 {dimension_numbers = #tpu.dot_dimension_numbers<[1], [0], [0], [1], [0, 0, 1, 1], [], []>} : vector<16x4xbf16>, vector<4x128xbf16>, vector<16x128xf32> -> vector<16x128xf32>
    %53 = arith.addf %51, %52 : vector<16x128xf32>
    %54 = vector.broadcast %6 : vector<16x1xf32> to vector<16x128xf32>
    %55 = arith.addf %53, %54 : vector<16x128xf32>
    %56 = arith.truncf %55 : vector<16x128xf32> to vector<16x128xbf16>
    %cst_34 = arith.constant dense<0.000000e+00> : vector<16x128xf32>
    %57 = tpu.matmul %3, %56, %cst_34 {dimension_numbers = #tpu.dot_dimension_numbers<[1], [0], [0], [1], [0, 0, 1, 1], [], []>} : vector<16x16xbf16>, vector<16x128xbf16>, vector<16x128xf32> -> vector<16x128xf32>
    %58 = vector.broadcast %7 : vector<16x1xf32> to vector<16x128xf32>
    %59 = arith.addf %57, %58 : vector<16x128xf32>
    %60 = arith.negf %59 : vector<16x128xf32>
    %61 = math.exp %60 : vector<16x128xf32>
    %cst_35 = arith.constant 1.000000e+00 : f32
    %62 = vector.broadcast %cst_35 : f32 to vector<16x128xf32>
    %63 = arith.addf %62, %61 : vector<16x128xf32>
    %64 = arith.divf %62, %63 : vector<16x128xf32>
    %65 = arith.truncf %64 : vector<16x128xf32> to vector<16x128xbf16>
    %cst_36 = arith.constant dense<0.000000e+00> : vector<16x128xf32>
    %66 = tpu.matmul %4, %65, %cst_36 {dimension_numbers = #tpu.dot_dimension_numbers<[1], [0], [0], [1], [0, 0, 1, 1], [], []>} : vector<16x16xbf16>, vector<16x128xbf16>, vector<16x128xf32> -> vector<16x128xf32>
    %67 = vector.broadcast %8 : vector<16x1xf32> to vector<16x128xf32>
    %68 = arith.addf %66, %67 : vector<16x128xf32>
    %69 = arith.negf %68 : vector<16x128xf32>
    %70 = math.exp %69 : vector<16x128xf32>
    %cst_37 = arith.constant 1.000000e+00 : f32
    %71 = vector.broadcast %cst_37 : f32 to vector<16x128xf32>
    %72 = arith.addf %71, %70 : vector<16x128xf32>
    %73 = arith.divf %71, %72 : vector<16x128xf32>
    %74 = arith.truncf %73 : vector<16x128xf32> to vector<16x128xbf16>
    %cst_38 = arith.constant dense<0.000000e+00> : vector<1x128xf32>
    %75 = tpu.matmul %5, %74, %cst_38 {dimension_numbers = #tpu.dot_dimension_numbers<[1], [0], [0], [1], [0, 0, 1, 1], [], []>} : vector<1x16xbf16>, vector<16x128xbf16>, vector<1x128xf32> -> vector<1x128xf32>
    %76 = vector.broadcast %9 : f32 to vector<1x128xf32>
    %77 = arith.addf %75, %76 : vector<1x128xf32>
    %c1_39 = arith.constant 1 : index
    %c0_40 = arith.constant 0 : index
    %78 = vector.load %arg12[%c1_39, %c0_40] : memref<4x128xf32, #tpu.memory_space<vmem>>, vector<1x128xf32>
    tpu.vector_store %arg12[%c1_39, %c0_40], %77 {strides = array<i32>} : memref<4x128xf32, #tpu.memory_space<vmem>>, vector<1x128xf32>,
    %c7_i32_41 = arith.constant 7 : i32
    %79 = tpu.dynamic_rotate %47 by %c7_i32_41 dim 0 : vector<8x128xf32>, i32 -> vector<8x128xf32>
    %80 = vector.shape_cast %77 : vector<1x128xf32> to vector<1x128xf32>
    %81 = vector.broadcast %80 : vector<1x128xf32> to vector<8x128xf32>
    %82 = arith.select %12, %81, %79 : vector<8x128xi1>, vector<8x128xf32>
    %c2 = arith.constant 2 : index
    %c0_42 = arith.constant 0 : index
    %c0_43 = arith.constant 0 : index
    %83 = vector.load %arg2[%c2, %c0_42, %c0_43] : memref<4x4x128xbf16, #tpu.memory_space<vmem>>, vector<1x4x128xbf16>
    %84 = vector.shape_cast %83 : vector<1x4x128xbf16> to vector<4x128xbf16>
    %85 = arith.truncf %82 : vector<8x128xf32> to vector<8x128xbf16>
    %cst_44 = arith.constant dense<0.000000e+00> : vector<16x128xf32>
    %86 = tpu.matmul %1, %85, %cst_44 {dimension_numbers = #tpu.dot_dimension_numbers<[1], [0], [0], [1], [0, 0, 1, 1], [], []>} : vector<16x8xbf16>, vector<8x128xbf16>, vector<16x128xf32> -> vector<16x128xf32>
    %cst_45 = arith.constant dense<0.000000e+00> : vector<16x128xf32>
    %87 = tpu.matmul %2, %84, %cst_45 {dimension_numbers = #tpu.dot_dimension_numbers<[1], [0], [0], [1], [0, 0, 1, 1], [], []>} : vector<16x4xbf16>, vector<4x128xbf16>, vector<16x128xf32> -> vector<16x128xf32>
    %88 = arith.addf %86, %87 : vector<16x128xf32>
    %89 = vector.broadcast %6 : vector<16x1xf32> to vector<16x128xf32>
    %90 = arith.addf %88, %89 : vector<16x128xf32>
    %91 = arith.truncf %90 : vector<16x128xf32> to vector<16x128xbf16>
    %cst_46 = arith.constant dense<0.000000e+00> : vector<16x128xf32>
    %92 = tpu.matmul %3, %91, %cst_46 {dimension_numbers = #tpu.dot_dimension_numbers<[1], [0], [0], [1], [0, 0, 1, 1], [], []>} : vector<16x16xbf16>, vector<16x128xbf16>, vector<16x128xf32> -> vector<16x128xf32>
    %93 = vector.broadcast %7 : vector<16x1xf32> to vector<16x128xf32>
    %94 = arith.addf %92, %93 : vector<16x128xf32>
    %95 = arith.negf %94 : vector<16x128xf32>
    %96 = math.exp %95 : vector<16x128xf32>
    %cst_47 = arith.constant 1.000000e+00 : f32
    %97 = vector.broadcast %cst_47 : f32 to vector<16x128xf32>
    %98 = arith.addf %97, %96 : vector<16x128xf32>
    %99 = arith.divf %97, %98 : vector<16x128xf32>
    %100 = arith.truncf %99 : vector<16x128xf32> to vector<16x128xbf16>
    %cst_48 = arith.constant dense<0.000000e+00> : vector<16x128xf32>
    %101 = tpu.matmul %4, %100, %cst_48 {dimension_numbers = #tpu.dot_dimension_numbers<[1], [0], [0], [1], [0, 0, 1, 1], [], []>} : vector<16x16xbf16>, vector<16x128xbf16>, vector<16x128xf32> -> vector<16x128xf32>
    %102 = vector.broadcast %8 : vector<16x1xf32> to vector<16x128xf32>
    %103 = arith.addf %101, %102 : vector<16x128xf32>
    %104 = arith.negf %103 : vector<16x128xf32>
    %105 = math.exp %104 : vector<16x128xf32>
    %cst_49 = arith.constant 1.000000e+00 : f32
    %106 = vector.broadcast %cst_49 : f32 to vector<16x128xf32>
    %107 = arith.addf %106, %105 : vector<16x128xf32>
    %108 = arith.divf %106, %107 : vector<16x128xf32>
    %109 = arith.truncf %108 : vector<16x128xf32> to vector<16x128xbf16>
    %cst_50 = arith.constant dense<0.000000e+00> : vector<1x128xf32>
    %110 = tpu.matmul %5, %109, %cst_50 {dimension_numbers = #tpu.dot_dimension_numbers<[1], [0], [0], [1], [0, 0, 1, 1], [], []>} : vector<1x16xbf16>, vector<16x128xbf16>, vector<1x128xf32> -> vector<1x128xf32>
    %111 = vector.broadcast %9 : f32 to vector<1x128xf32>
    %112 = arith.addf %110, %111 : vector<1x128xf32>
    %c2_51 = arith.constant 2 : index
    %c0_52 = arith.constant 0 : index
    %113 = vector.load %arg12[%c2_51, %c0_52] : memref<4x128xf32, #tpu.memory_space<vmem>>, vector<1x128xf32>
    tpu.vector_store %arg12[%c2_51, %c0_52], %112 {strides = array<i32>} : memref<4x128xf32, #tpu.memory_space<vmem>>, vector<1x128xf32>,
    %c7_i32_53 = arith.constant 7 : i32
    %114 = tpu.dynamic_rotate %82 by %c7_i32_53 dim 0 : vector<8x128xf32>, i32 -> vector<8x128xf32>
    %115 = vector.shape_cast %112 : vector<1x128xf32> to vector<1x128xf32>
    %116 = vector.broadcast %115 : vector<1x128xf32> to vector<8x128xf32>
    %117 = arith.select %12, %116, %114 : vector<8x128xi1>, vector<8x128xf32>
    %c3 = arith.constant 3 : index
    %c0_54 = arith.constant 0 : index
    %c0_55 = arith.constant 0 : index
    %118 = vector.load %arg2[%c3, %c0_54, %c0_55] : memref<4x4x128xbf16, #tpu.memory_space<vmem>>, vector<1x4x128xbf16>
    %119 = vector.shape_cast %118 : vector<1x4x128xbf16> to vector<4x128xbf16>
    %120 = arith.truncf %117 : vector<8x128xf32> to vector<8x128xbf16>
    %cst_56 = arith.constant dense<0.000000e+00> : vector<16x128xf32>
    %121 = tpu.matmul %1, %120, %cst_56 {dimension_numbers = #tpu.dot_dimension_numbers<[1], [0], [0], [1], [0, 0, 1, 1], [], []>} : vector<16x8xbf16>, vector<8x128xbf16>, vector<16x128xf32> -> vector<16x128xf32>
    %cst_57 = arith.constant dense<0.000000e+00> : vector<16x128xf32>
    %122 = tpu.matmul %2, %119, %cst_57 {dimension_numbers = #tpu.dot_dimension_numbers<[1], [0], [0], [1], [0, 0, 1, 1], [], []>} : vector<16x4xbf16>, vector<4x128xbf16>, vector<16x128xf32> -> vector<16x128xf32>
    %123 = arith.addf %121, %122 : vector<16x128xf32>
    %124 = vector.broadcast %6 : vector<16x1xf32> to vector<16x128xf32>
    %125 = arith.addf %123, %124 : vector<16x128xf32>
    %126 = arith.truncf %125 : vector<16x128xf32> to vector<16x128xbf16>
    %cst_58 = arith.constant dense<0.000000e+00> : vector<16x128xf32>
    %127 = tpu.matmul %3, %126, %cst_58 {dimension_numbers = #tpu.dot_dimension_numbers<[1], [0], [0], [1], [0, 0, 1, 1], [], []>} : vector<16x16xbf16>, vector<16x128xbf16>, vector<16x128xf32> -> vector<16x128xf32>
    %128 = vector.broadcast %7 : vector<16x1xf32> to vector<16x128xf32>
    %129 = arith.addf %127, %128 : vector<16x128xf32>
    %130 = arith.negf %129 : vector<16x128xf32>
    %131 = math.exp %130 : vector<16x128xf32>
    %cst_59 = arith.constant 1.000000e+00 : f32
    %132 = vector.broadcast %cst_59 : f32 to vector<16x128xf32>
    %133 = arith.addf %132, %131 : vector<16x128xf32>
    %134 = arith.divf %132, %133 : vector<16x128xf32>
    %135 = arith.truncf %134 : vector<16x128xf32> to vector<16x128xbf16>
    %cst_60 = arith.constant dense<0.000000e+00> : vector<16x128xf32>
    %136 = tpu.matmul %4, %135, %cst_60 {dimension_numbers = #tpu.dot_dimension_numbers<[1], [0], [0], [1], [0, 0, 1, 1], [], []>} : vector<16x16xbf16>, vector<16x128xbf16>, vector<16x128xf32> -> vector<16x128xf32>
    %137 = vector.broadcast %8 : vector<16x1xf32> to vector<16x128xf32>
    %138 = arith.addf %136, %137 : vector<16x128xf32>
    %139 = arith.negf %138 : vector<16x128xf32>
    %140 = math.exp %139 : vector<16x128xf32>
    %cst_61 = arith.constant 1.000000e+00 : f32
    %141 = vector.broadcast %cst_61 : f32 to vector<16x128xf32>
    %142 = arith.addf %141, %140 : vector<16x128xf32>
    %143 = arith.divf %141, %142 : vector<16x128xf32>
    %144 = arith.truncf %143 : vector<16x128xf32> to vector<16x128xbf16>
    %cst_62 = arith.constant dense<0.000000e+00> : vector<1x128xf32>
    %145 = tpu.matmul %5, %144, %cst_62 {dimension_numbers = #tpu.dot_dimension_numbers<[1], [0], [0], [1], [0, 0, 1, 1], [], []>} : vector<1x16xbf16>, vector<16x128xbf16>, vector<1x128xf32> -> vector<1x128xf32>
    %146 = vector.broadcast %9 : f32 to vector<1x128xf32>
    %147 = arith.addf %145, %146 : vector<1x128xf32>
    %c3_63 = arith.constant 3 : index
    %c0_64 = arith.constant 0 : index
    %148 = vector.load %arg12[%c3_63, %c0_64] : memref<4x128xf32, #tpu.memory_space<vmem>>, vector<1x128xf32>
    tpu.vector_store %arg12[%c3_63, %c0_64], %147 {strides = array<i32>} : memref<4x128xf32, #tpu.memory_space<vmem>>, vector<1x128xf32>,
    return
  }
  func.func @transform_0(%arg0: i32) -> (i32, i32) {
    %c0_i32 = arith.constant 0 : i32
    %c0_i32_0 = arith.constant 0 : i32
    return %c0_i32, %arg0 : i32, i32
  }
  func.func @transform_1(%arg0: i32) -> (i32, i32, i32) {
    %c0_i32 = arith.constant 0 : i32
    %c0_i32_0 = arith.constant 0 : i32
    %c0_i32_1 = arith.constant 0 : i32
    return %c0_i32, %c0_i32_0, %arg0 : i32, i32, i32
  }
  func.func @transform_2(%arg0: i32) -> (i32, i32) {
    %c0_i32 = arith.constant 0 : i32
    %c0_i32_0 = arith.constant 0 : i32
    %c0_i32_1 = arith.constant 0 : i32
    return %c0_i32, %c0_i32_0 : i32, i32
  }
  func.func @transform_3(%arg0: i32) -> (i32, i32) {
    %c0_i32 = arith.constant 0 : i32
    %c0_i32_0 = arith.constant 0 : i32
    %c0_i32_1 = arith.constant 0 : i32
    return %c0_i32, %c0_i32_0 : i32, i32
  }
  func.func @transform_4(%arg0: i32) -> (i32, i32) {
    %c0_i32 = arith.constant 0 : i32
    %c0_i32_0 = arith.constant 0 : i32
    %c0_i32_1 = arith.constant 0 : i32
    return %c0_i32, %c0_i32_0 : i32, i32
  }
  func.func @transform_5(%arg0: i32) -> (i32, i32) {
    %c0_i32 = arith.constant 0 : i32
    %c0_i32_0 = arith.constant 0 : i32
    %c0_i32_1 = arith.constant 0 : i32
    return %c0_i32, %c0_i32_0 : i32, i32
  }
  func.func @transform_6(%arg0: i32) -> (i32, i32) {
    %c0_i32 = arith.constant 0 : i32
    %c0_i32_0 = arith.constant 0 : i32
    %c0_i32_1 = arith.constant 0 : i32
    return %c0_i32, %c0_i32_0 : i32, i32
  }
  func.func @transform_7(%arg0: i32) -> (i32, i32) {
    %c0_i32 = arith.constant 0 : i32
    %c0_i32_0 = arith.constant 0 : i32
    %c0_i32_1 = arith.constant 0 : i32
    return %c0_i32, %c0_i32_0 : i32, i32
  }
  func.func @transform_8(%arg0: i32) -> (i32, i32) {
    %c0_i32 = arith.constant 0 : i32
    %c0_i32_0 = arith.constant 0 : i32
    %c0_i32_1 = arith.constant 0 : i32
    return %c0_i32, %c0_i32_0 : i32, i32
  }
  func.func @transform_9(%arg0: i32) -> (i32, i32) {
    %c0_i32 = arith.constant 0 : i32
    %c0_i32_0 = arith.constant 0 : i32
    %c0_i32_1 = arith.constant 0 : i32
    return %c0_i32, %c0_i32_0 : i32, i32
  }
  func.func @transform_10(%arg0: i32) -> i32 {
    %c0_i32 = arith.constant 0 : i32
    %c0_i32_0 = arith.constant 0 : i32
    return %c0_i32 : i32
  }
  func.func @transform_11(%arg0: i32) -> (i32, i32) {
    %c0_i32 = arith.constant 0 : i32
    %c0_i32_0 = arith.constant 0 : i32
    return %c0_i32, %arg0 : i32, i32
  }
}

</mosaic_0001>

<bundles_post_ra>
// kernel: tpu_custom_call.1
= control target key start
LH: loop header
LB: loop body
LE: loop exit
PB: predicated region body
PF: predicated region fallthrough
CT: control target
= control target key end

     0   :  { %vm72_vm0 = vcmask 1041408   ;;  %v1436_v2 = vmov 0.0   ;;  %vm126_vm1 = vcmask 1043456   ;;  %vm1437_vm2 = vmmov 0   ;;  %s1753_s0 = inlined_call_operand.vmem [shape: f32[8,128], index: 0, kind: input, shape index: {}]   ;;  %s1754_s1 = inlined_call_operand.vmem [shape: bf16[4,4,128], index: 1, kind: input, shape index: {}]   ;;  %s1755_s2 = inlined_call_operand.vmem [shape: bf16[16,8], index: 2, kind: input, shape index: {}]   ;;  %s1756_s3 = inlined_call_operand.vmem [shape: bf16[16,4], index: 3, kind: input, shape index: {}]   ;;  %s1757_s4 = inlined_call_operand.vmem [shape: f32[16,1], index: 4, kind: input, shape index: {}]   ;;  %s1758_s5 = inlined_call_operand.vmem [shape: bf16[16,16], index: 5, kind: input, shape index: {}]   ;;  %s1759_s6 = inlined_call_operand.vmem [shape: f32[16,1], index: 6, kind: input, shape index: {}]   ;;  %s1760_s7 = inlined_call_operand.vmem [shape: bf16[16,16], index: 7, kind: input, shape index: {}]   ;;  %s1761_s8 = inlined_call_operand.vmem [shape: f32[16,1], index: 8, kind: input, shape index: {}]   ;;  %s1762_s9 = inlined_call_operand.vmem [shape: bf16[1,16], index: 9, kind: input, shape index: {}]   ;;  %s1763_s10 = inlined_call_operand.<no memory space> [shape: f32[1], index: 10, kind: input, shape index: {}]   ;;  %s1764_s11 = inlined_call_operand.hbm [shape: f32[4,128], index: 11, kind: output, shape index: {}]  }
   0x1   :  { %v61_v0 = vld [vmem:[%s1754_s1] sm:$0x3]  ;;  %1218 = vmatprep.subr.bf16.mxu0 %v1436_v2  ;;  %1224 = vmatprep.subr.bf16.mxu1 %v1436_v2  ;;  %vm68_vm3 = vcmask 31744   ;;  %vm122_vm4 = vcmask 64512   ;;  %v1438_v9 = vmov 0   ;;  %v52_v10 = vld [vmem:[%s1757_s4 + $0x8] sm:$0xff] }
   0x2   :  { %v1506_v1 = vld [vmem:[%s1753_s0] sm:$0xff]  ;;  %v74_v3 = vsel %vm72_vm0, %v61_v0, 0  ;;  %1220 = vmatprep.mubr.msk.bf16.mxu0 %vm1437_vm2, %v1436_v2  ;;  %1226 = vmatprep.mubr.msk.bf16.mxu1 %vm1437_vm2, %v1436_v2 }
   0x3   :  { %v62_v4 = vpack.c.bf16 %v1506_v1, %v1506_v1  ;;  %v1516_v5 = vld [vmem:[%s1756_s3] sm:$0xff]   ;;  %1219 = vmatpush3.bf16.msra.mxu0 %v74_v3  ;;  %1342 = vset.pattern.permute.xlu0 %v1438_v9 }
   0x4   :  { %v1526_v7 = vld [vmem:[%s1755_s2] sm:$0xff]   ;;  %1230 = vmatprep.subr.bf16.mxu0 %v1436_v2  ;;  %1343 = vset.pattern.permute.xlu1 %v1438_v9 }
   0x5   :  { %v128_v6 = vsel %vm126_vm1, %v62_v4, 0  ;;  %v51_v8 = vld [vmem:[%s1757_s4] sm:$0xff] }
   0x6   :  { %1225 = vmatpush3.bf16.msra.mxu1 %v128_v6  ;;  %1221 = vmatmul.mubr.msk.bf16.vlgmr.msra.gmra.mrb[0].mxu0 %vm68_vm3, %v1516_v5 }
   0x7   :  { %173 = vperm.xlu0 %1342, %v51_v8   ;;  %1232 = vmatprep.mubr.msk.bf16.mxu0 %vm1437_vm2, %v1436_v2 }
   0x8   :  { %17 = vsyncpa [#allocation4], 0  ;;  %1236 = vmatprep.subr.bf16.mxu1 %v1436_v2  ;;  %v55_v11 = vld [vmem:[%s1761_s8] sm:$0xff]  ;;  %v54_v13 = vld [vmem:[%s1759_s6 + $0x8] sm:$0xff]  ;;  %vm199_vm5 = vcmask 130048   ;;  %v58_v9 = vlaneseq }
   0x9   :  { %1227 = vmatmul.mubr.msk.bf16.vlgmr.msra.gmra.mrb[0].mxu1 %vm122_vm4, %v1526_v7  ;;  %v53_v12 = vld [vmem:[%s1759_s6] sm:$0xff]  ;;  %v56_v14 = vld [vmem:[%s1761_s8 + $0x8] sm:$0xff] }
   0xa   :  { %1238 = vmatprep.mubr.msk.bf16.mxu1 %vm1437_vm2, %v1436_v2  ;;  %186 = vperm.xlu1 %1343, %v53_v12   ;;  %v1565_v30 = vld [vmem:[%s1758_s5] sm:$0xff]  }
   0xb   :  { %178 = vperm.xlu0 %1342, %v52_v10   ;;  %v1581_v48 = vld [vmem:[%s1760_s7] sm:$0xff]   ;;  %v1613_v10 = vshrl.u32 %v58_v9, 7 }
   0xc   :  { %v1597_v4 = vld [vmem:[%s1762_s9] sm:$0x1]  ;;  %v1148_v6 = vld [vmem:[%s1754_s1 + $0x2] sm:$0x3] }
   0xd   :  { %v384_v8 = vsel %vm72_vm0, %v1148_v6, 0  ;;  %v1621_v12 = vsub.s32 0, %v1613_v10  ;;  %vm60_vm6 = vcmp.eq.s32.totalorder %v1613_v10, 7 }
   0xe   :  { %191 = vperm.xlu1 %1343, %v54_v13  }
   0xf   :  { %259 = vperm.xlu0 %1342, %v55_v11   ;;  %v1618_v11 = vstv %s1763_s10 }
  0x12   :  { %264 = vperm.xlu1 %1343, %v56_v14   ;;  %v374_v14 = vrot.slane %v1506_v1, 1 }
  0x86   :  { %v1556_v15 = vpop.permute.xlu0 %173 }
  0x89   :  { %v1572_v31 = vpop.permute.xlu1 %186 }
  0x8a   :  { %v1558_v26 = vpop.permute.xlu0 %178 }
  0x8d   :  { %v1575_v35 = vpop.permute.xlu1 %191 }
  0x8e   :  { %v1588_v49 = vpop.permute.xlu0 %259 }
  0x91   :  { %v1591_v53 = vpop.permute.xlu1 %264 }
  0xd9   :  { %v110_v16 = vpop.f32.mrb[0].mxu0 }
  0xda   :  { %v1222_v17 = vpop.f32.mrb[1].mxu0 }
  0xdb   :  { %v113_v18 = vpop.f32.mrb[2].mxu0 }
  0xdc   :  { %v164_v19 = vpop.f32.mrb[0].mxu1  ;;  %v1223_v21 = vpop.f32.mrb[3].mxu0 }
  0xdd   :  { %v165_v20 = vadd.f32 %v164_v19, %v110_v16  ;;  %v1228_v22 = vpop.f32.mrb[1].mxu1 }
  0xde   :  { %v167_v23 = vpop.f32.mrb[2].mxu1 }
  0xdf   :  { %v168_v24 = vadd.f32 %v167_v23, %v113_v18  ;;  %v1229_v25 = vpop.f32.mrb[3].mxu1  ;;  %v181_v27 = vadd.f32 %v1556_v15, %v165_v20 }
  0xe1   :  { %v182_v28 = vadd.f32 %v1558_v26, %v168_v24 }
  0xe3   :  { %v183_v29 = vpack.c.bf16 %v182_v28, %v181_v27 }
  0xe5   :  { %1231 = vmatpush3.bf16.msra.mxu0 %v183_v29 }
  0xe6   :  { %1242 = vmatprep.subr.bf16.mxu0 %v1436_v2 }
  0xe8   :  { %1233 = vmatmul.mubr.msk.bf16.vlgmr.msra.gmra.mrb[4].mxu0 %vm199_vm5, %v1565_v30 }
  0xe9   :  { %1244 = vmatprep.mubr.msk.bf16.mxu0 %vm1437_vm2, %v1436_v2 }
 0x1bb   :  { %v237_v32 = vpop.f32.mrb[4].mxu0 }
 0x1bc   :  { %v238_v33 = vadd.f32 %v237_v32, %v1572_v31  ;;  %v1234_v34 = vpop.f32.mrb[5].mxu0 }
 0x1bd   :  { %v240_v36 = vpop.f32.mrb[6].mxu0 }
 0x1be   :  { %v1141_v37 = vmul.f32 -1.442695, %v238_v33  ;;  %v241_v38 = vadd.f32 %v240_v36, %v1575_v35  ;;  %v1235_v39 = vpop.f32.mrb[7].mxu0 }
 0x1c0   :  { %1348 = vpow2.f32 %v1141_v37  ;;  %v1142_v40 = vmul.f32 -1.442695, %v241_v38 }
 0x1c2   :  { %1350 = vpow2.f32 %v1142_v40 }
 0x1ca   :  { %v1349_v41 = vpop.eup %1348 }
 0x1cb   :  { %v250_v42 = vadd.f32 1.0, %v1349_v41 }
 0x1cc   :  { %v1351_v43 = vpop.eup %1350 }
 0x1cd   :  { %v251_v44 = vadd.f32 1.0, %v1351_v43  ;;  %1352 = vrcp.f32 %v250_v42 }
 0x1cf   :  { %1354 = vrcp.f32 %v251_v44 }
 0x1d7   :  { %v1353_v45 = vpop.eup %1352 }
 0x1d9   :  { %v1355_v46 = vpop.eup %1354 }
 0x1da   :  { %v256_v47 = vpack.c.bf16 %v1355_v46, %v1353_v45 }
 0x1dc   :  { %1237 = vmatpush3.bf16.msra.mxu1 %v256_v47 }
 0x1dd   :  { %1248 = vmatprep.subr.bf16.mxu1 %v1436_v2 }
 0x1df   :  { %1239 = vmatmul.mubr.msk.bf16.vlgmr.msra.gmra.mrb[4].mxu1 %vm199_vm5, %v1581_v48 }
 0x1e0   :  { %1250 = vmatprep.mubr.msk.bf16.mxu1 %vm1437_vm2, %v1436_v2  ;;  %1249 = vmatpush3.bf16.msra.mxu1 %v384_v8 }
 0x1e1   :  { %1260 = vmatprep.subr.bf16.mxu1 %v1436_v2 }
 0x1e7   :  { %1251 = vmatmul.mubr.msk.bf16.vlgmr.msra.gmra.mrb[8].mxu1 %vm68_vm3, %v1516_v5 }
 0x1e8   :  { %1262 = vmatprep.mubr.msk.bf16.mxu1 %vm1437_vm2, %v1436_v2 }
 0x2b2   :  { %v309_v50 = vpop.f32.mrb[4].mxu1 }
 0x2b3   :  { %v310_v51 = vadd.f32 %v309_v50, %v1588_v49  ;;  %v1240_v52 = vpop.f32.mrb[5].mxu1 }
 0x2b4   :  { %v312_v54 = vpop.f32.mrb[6].mxu1 }
 0x2b5   :  { %v1145_v55 = vmul.f32 -1.442695, %v310_v51  ;;  %v313_v56 = vadd.f32 %v312_v54, %v1591_v53  ;;  %v1241_v57 = vpop.f32.mrb[7].mxu1 }
 0x2b7   :  { %1356 = vpow2.f32 %v1145_v55  ;;  %v1146_v58 = vmul.f32 -1.442695, %v313_v56 }
 0x2b9   :  { %1358 = vpow2.f32 %v1146_v58 }
 0x2ba   :  { %v420_v1 = vpop.f32.mrb[8].mxu1 }
 0x2bb   :  { %v1252_v24 = vpop.f32.mrb[9].mxu1 }
 0x2bc   :  { %v423_v25 = vpop.f32.mrb[10].mxu1 }
 0x2bd   :  { %v1253_v27 = vpop.f32.mrb[11].mxu1 }
 0x2c1   :  { %v1357_v59 = vpop.eup %1356 }
 0x2c2   :  { %v322_v60 = vadd.f32 1.0, %v1357_v59 }
 0x2c3   :  { %v1359_v61 = vpop.eup %1358 }
 0x2c4   :  { %v323_v62 = vadd.f32 1.0, %v1359_v61  ;;  %1360 = vrcp.f32 %v322_v60 }
 0x2c6   :  { %1362 = vrcp.f32 %v323_v62 }
 0x2ce   :  { %v1361_v63 = vpop.eup %1360 }
 0x2d0   :  { %v1363_v0 = vpop.eup %1362 }
 0x2d1   :  { %v328_v3 = vpack.c.bf16 %v1363_v0, %v1361_v63 }
 0x2d3   :  { %1243 = vmatpush3.bf16.msra.mxu0 %v328_v3 }
 0x2d4   :  { %1254 = vmatprep.subr.bf16.mxu0 %v1436_v2 }
 0x2d6   :  { %1245 = vmatmul.mubr.msk.bf16.vlgmr.msra.gmra.mrb[8].mxu0 %vm199_vm5, %v1597_v4 }
 0x2d7   :  { %1256 = vmatprep.mubr.msk.bf16.mxu0 %vm1437_vm2, %v1436_v2 }
 0x3a9   :  { %v367_v13 = vpop.f32.mrb[8].mxu0 }
 0x3aa   :  { %v368_v16 = vadd.f32 %v367_v13, %v1618_v11  ;;  %v1246_v17 = vpop.f32.mrb[9].mxu0 }
 0x3ab   :  { %v370_v18 = vpop.f32.mrb[10].mxu0 }
 0x3ac   :  { %373 = vst [vmem:[#allocation3] sm:$0x1] %v368_v16  ;;  %v378_v19 = vrot.slane %v368_v16, %v1621_v12  ;;  %v1247_v20 = vpop.f32.mrb[11].mxu0  ;;  %v1158_v18 = vld [vmem:[%s1754_s1 + $0x4] sm:$0x3] }
 0x3ae   :  { %v1629_v21 = vsel %vm60_vm6, %v378_v19, %v374_v14  ;;  %v633_v19 = vsel %vm72_vm0, %v1158_v18, 0 }
 0x3af   :  { %v382_v22 = vpack.c.bf16 %v1629_v21, %v1629_v21  ;;  %v623_v24 = vrot.slane %v1629_v21, 1 }
 0x3b1   :  { %v428_v23 = vsel %vm126_vm1, %v382_v22, 0 }
 0x3b2   :  { %1255 = vmatpush3.bf16.msra.mxu0 %v428_v23 }
 0x3b3   :  { %1266 = vmatprep.subr.bf16.mxu0 %v1436_v2 }
 0x3b5   :  { %1257 = vmatmul.mubr.msk.bf16.vlgmr.msra.gmra.mrb[12].mxu0 %vm122_vm4, %v1526_v7 }
 0x3b6   :  { %1268 = vmatprep.mubr.msk.bf16.mxu0 %vm1437_vm2, %v1436_v2 }
 0x488   :  { %v464_v28 = vpop.f32.mrb[12].mxu0 }
 0x489   :  { %v465_v29 = vadd.f32 %v464_v28, %v420_v1  ;;  %v1258_v32 = vpop.f32.mrb[13].mxu0 }
 0x48a   :  { %v467_v33 = vpop.f32.mrb[14].mxu0 }
 0x48b   :  { %v468_v34 = vadd.f32 %v467_v33, %v423_v25  ;;  %v1259_v36 = vpop.f32.mrb[15].mxu0  ;;  %v471_v37 = vadd.f32 %v465_v29, %v1556_v15 }
 0x48d   :  { %v472_v38 = vadd.f32 %v468_v34, %v1558_v26 }
 0x48f   :  { %v473_v39 = vpack.c.bf16 %v472_v38, %v471_v37 }
 0x491   :  { %1261 = vmatpush3.bf16.msra.mxu1 %v473_v39 }
 0x492   :  { %1272 = vmatprep.subr.bf16.mxu1 %v1436_v2 }
 0x494   :  { %1263 = vmatmul.mubr.msk.bf16.vlgmr.msra.gmra.mrb[12].mxu1 %vm199_vm5, %v1565_v30 }
 0x495   :  { %1274 = vmatprep.mubr.msk.bf16.mxu1 %vm1437_vm2, %v1436_v2 }
 0x567   :  { %v508_v40 = vpop.f32.mrb[12].mxu1 }
 0x568   :  { %v509_v41 = vadd.f32 %v508_v40, %v1572_v31  ;;  %v1264_v42 = vpop.f32.mrb[13].mxu1 }
 0x569   :  { %v511_v43 = vpop.f32.mrb[14].mxu1 }
 0x56a   :  { %v1152_v44 = vmul.f32 -1.442695, %v509_v41  ;;  %v512_v45 = vadd.f32 %v511_v43, %v1575_v35  ;;  %v1265_v46 = vpop.f32.mrb[15].mxu1 }
 0x56c   :  { %1364 = vpow2.f32 %v1152_v44  ;;  %v1153_v47 = vmul.f32 -1.442695, %v512_v45 }
 0x56e   :  { %1366 = vpow2.f32 %v1153_v47 }
 0x576   :  { %v1365_v50 = vpop.eup %1364 }
 0x577   :  { %v521_v51 = vadd.f32 1.0, %v1365_v50 }
 0x578   :  { %v1367_v52 = vpop.eup %1366 }
 0x579   :  { %v522_v54 = vadd.f32 1.0, %v1367_v52  ;;  %1368 = vrcp.f32 %v521_v51 }
 0x57b   :  { %1370 = vrcp.f32 %v522_v54 }
 0x583   :  { %v1369_v55 = vpop.eup %1368 }
 0x585   :  { %v1371_v56 = vpop.eup %1370 }
 0x586   :  { %v527_v57 = vpack.c.bf16 %v1371_v56, %v1369_v55 }
 0x588   :  { %1267 = vmatpush3.bf16.msra.mxu0 %v527_v57 }
 0x589   :  { %1278 = vmatprep.subr.bf16.mxu0 %v1436_v2 }
 0x58b   :  { %1269 = vmatmul.mubr.msk.bf16.vlgmr.msra.gmra.mrb[16].mxu0 %vm199_vm5, %v1581_v48 }
 0x58c   :  { %1280 = vmatprep.mubr.msk.bf16.mxu0 %vm1437_vm2, %v1436_v2  ;;  %1279 = vmatpush3.bf16.msra.mxu0 %v633_v19 }
 0x58d   :  { %1290 = vmatprep.subr.bf16.mxu0 %v1436_v2 }
 0x593   :  { %1281 = vmatmul.mubr.msk.bf16.vlgmr.msra.gmra.mrb[20].mxu0 %vm68_vm3, %v1516_v5 }
 0x594   :  { %1292 = vmatprep.mubr.msk.bf16.mxu0 %vm1437_vm2, %v1436_v2 }
 0x65e   :  { %v562_v58 = vpop.f32.mrb[16].mxu0 }
 0x65f   :  { %v563_v59 = vadd.f32 %v562_v58, %v1588_v49  ;;  %v1270_v60 = vpop.f32.mrb[17].mxu0 }
 0x660   :  { %v565_v61 = vpop.f32.mrb[18].mxu0 }
 0x661   :  { %v1155_v62 = vmul.f32 -1.442695, %v563_v59  ;;  %v566_v63 = vadd.f32 %v565_v61, %v1591_v53  ;;  %v1271_v0 = vpop.f32.mrb[19].mxu0 }
 0x663   :  { %1372 = vpow2.f32 %v1155_v62  ;;  %v1156_v3 = vmul.f32 -1.442695, %v566_v63 }
 0x665   :  { %1374 = vpow2.f32 %v1156_v3 }
 0x666   :  { %v669_v21 = vpop.f32.mrb[20].mxu0 }
 0x667   :  { %v1282_v33 = vpop.f32.mrb[21].mxu0 }
 0x668   :  { %v672_v34 = vpop.f32.mrb[22].mxu0 }
 0x669   :  { %v1283_v36 = vpop.f32.mrb[23].mxu0 }
 0x66d   :  { %v1373_v6 = vpop.eup %1372 }
 0x66e   :  { %v575_v8 = vadd.f32 1.0, %v1373_v6 }
 0x66f   :  { %v1375_v9 = vpop.eup %1374 }
 0x670   :  { %v576_v13 = vadd.f32 1.0, %v1375_v9  ;;  %1376 = vrcp.f32 %v575_v8 }
 0x672   :  { %1378 = vrcp.f32 %v576_v13 }
 0x67a   :  { %v1377_v14 = vpop.eup %1376 }
 0x67c   :  { %v1379_v16 = vpop.eup %1378 }
 0x67d   :  { %v581_v17 = vpack.c.bf16 %v1379_v16, %v1377_v14 }
 0x67f   :  { %1273 = vmatpush3.bf16.msra.mxu1 %v581_v17 }
 0x680   :  { %1284 = vmatprep.subr.bf16.mxu1 %v1436_v2 }
 0x682   :  { %1275 = vmatmul.mubr.msk.bf16.vlgmr.msra.gmra.mrb[16].mxu1 %vm199_vm5, %v1597_v4 }
 0x683   :  { %1286 = vmatprep.mubr.msk.bf16.mxu1 %vm1437_vm2, %v1436_v2 }
 0x755   :  { %v616_v20 = vpop.f32.mrb[16].mxu1 }
 0x756   :  { %v617_v22 = vadd.f32 %v616_v20, %v1618_v11  ;;  %v1276_v23 = vpop.f32.mrb[17].mxu1 }
 0x757   :  { %v619_v1 = vpop.f32.mrb[18].mxu1 }
 0x758   :  { %622 = vst [vmem:[#allocation3 + $0x1] sm:$0x1] %v617_v22  ;;  %v627_v25 = vrot.slane %v617_v22, %v1621_v12  ;;  %v1277_v27 = vpop.f32.mrb[19].mxu1 }
 0x75a   :  { %v1674_v28 = vsel %vm60_vm6, %v627_v25, %v623_v24  ;;  %v1168_v24 = vld [vmem:[%s1754_s1 + $0x6] sm:$0x3]  ;;  %s1439_s1 = smov [#allocation3]  }
 0x75b   :  { %v631_v29 = vpack.c.bf16 %v1674_v28, %v1674_v28  ;;  %v882_v25 = vsel %vm72_vm0, %v1168_v24, 0  ;;  %v872_v33 = vrot.slane %v1674_v28, 1  ;;  %s1127_s22 = sshll.u32 %s1439_s1, 4  ;;  %s1128_s22 = int_to_ptr.vmem [resolvable:$true] %s1127_s22 }
 0x75c   :  { %s1412_s0 = scalar_lea.vmem %s1128_s22, 64  ;;  %p1417_p1 = scmp.lt.s32.totalorder %s1128_s22, %s1128_s22 }
 0x75d   :  { %v677_v32 = vsel %vm126_vm1, %v631_v29, 0  ;;  %p1413_p0 = scmp.ne.s32.totalorder %s1128_s22, %s1412_s0  ;;  %p1418_p2 = scmp.lt.s32.totalorder %s1412_s0, %s1412_s0 }
 0x75e   :  { %1285 = vmatpush3.bf16.msra.mxu1 %v677_v32 }
 0x75f   :  { %1296 = vmatprep.subr.bf16.mxu1 %v1436_v2  ;;  %p1419_p3 = por %p1418_p2, %p1417_p1 }
 0x761   :  { %1287 = vmatmul.mubr.msk.bf16.vlgmr.msra.gmra.mrb[20].mxu1 %vm122_vm4, %v1526_v7  ;;  %p1420_p4 = pnand %p1419_p3, %p1413_p0 }
 0x762   :  { %1298 = vmatprep.mubr.msk.bf16.mxu1 %vm1437_vm2, %v1436_v2 }
 0x834   :  { %v713_v37 = vpop.f32.mrb[20].mxu1 }
 0x835   :  { %v714_v38 = vadd.f32 %v713_v37, %v669_v21  ;;  %v1288_v39 = vpop.f32.mrb[21].mxu1 }
 0x836   :  { %v716_v40 = vpop.f32.mrb[22].mxu1 }
 0x837   :  { %v717_v41 = vadd.f32 %v716_v40, %v672_v34  ;;  %v1289_v42 = vpop.f32.mrb[23].mxu1  ;;  %v720_v43 = vadd.f32 %v714_v38, %v1556_v15 }
 0x839   :  { %v721_v44 = vadd.f32 %v717_v41, %v1558_v26 }
 0x83b   :  { %v722_v45 = vpack.c.bf16 %v721_v44, %v720_v43 }
 0x83d   :  { %1291 = vmatpush3.bf16.msra.mxu0 %v722_v45 }
 0x83e   :  { %1302 = vmatprep.subr.bf16.mxu0 %v1436_v2 }
 0x840   :  { %1293 = vmatmul.mubr.msk.bf16.vlgmr.msra.gmra.mrb[24].mxu0 %vm199_vm5, %v1565_v30 }
 0x841   :  { %1304 = vmatprep.mubr.msk.bf16.mxu0 %vm1437_vm2, %v1436_v2 }
 0x913   :  { %v757_v46 = vpop.f32.mrb[24].mxu0 }
 0x914   :  { %v758_v47 = vadd.f32 %v757_v46, %v1572_v31  ;;  %v1294_v50 = vpop.f32.mrb[25].mxu0 }
 0x915   :  { %v760_v51 = vpop.f32.mrb[26].mxu0 }
 0x916   :  { %v1162_v52 = vmul.f32 -1.442695, %v758_v47  ;;  %v761_v54 = vadd.f32 %v760_v51, %v1575_v35  ;;  %v1295_v55 = vpop.f32.mrb[27].mxu0 }
 0x918   :  { %1380 = vpow2.f32 %v1162_v52  ;;  %v1163_v56 = vmul.f32 -1.442695, %v761_v54 }
 0x91a   :  { %1382 = vpow2.f32 %v1163_v56 }
 0x922   :  { %v1381_v57 = vpop.eup %1380 }
 0x923   :  { %v770_v58 = vadd.f32 1.0, %v1381_v57 }
 0x924   :  { %v1383_v59 = vpop.eup %1382 }
 0x925   :  { %v771_v60 = vadd.f32 1.0, %v1383_v59  ;;  %1384 = vrcp.f32 %v770_v58 }
 0x927   :  { %1386 = vrcp.f32 %v771_v60 }
 0x92f   :  { %v1385_v61 = vpop.eup %1384 }
 0x931   :  { %v1387_v62 = vpop.eup %1386 }
 0x932   :  { %v776_v63 = vpack.c.bf16 %v1387_v62, %v1385_v61 }
 0x934   :  { %1297 = vmatpush3.bf16.msra.mxu1 %v776_v63 }
 0x935   :  { %1308 = vmatprep.subr.bf16.mxu1 %v1436_v2 }
 0x937   :  { %1299 = vmatmul.mubr.msk.bf16.vlgmr.msra.gmra.mrb[24].mxu1 %vm199_vm5, %v1581_v48 }
 0x938   :  { %1310 = vmatprep.mubr.msk.bf16.mxu1 %vm1437_vm2, %v1436_v2  ;;  %1309 = vmatpush3.bf16.msra.mxu1 %v882_v25 }
 0x939   :  { %1320 = vmatprep.subr.bf16.mxu1 %v1436_v2 }
 0x93f   :  { %1311 = vmatmul.mubr.msk.bf16.vlgmr.msra.gmra.mrb[28].mxu1 %vm68_vm3, %v1516_v5 }
 0x940   :  { %1322 = vmatprep.mubr.msk.bf16.mxu1 %vm1437_vm2, %v1436_v2 }
 0xa0a   :  { %v811_v0 = vpop.f32.mrb[24].mxu1 }
 0xa0b   :  { %v812_v3 = vadd.f32 %v811_v0, %v1588_v49  ;;  %v1300_v6 = vpop.f32.mrb[25].mxu1 }
 0xa0c   :  { %v814_v8 = vpop.f32.mrb[26].mxu1 }
 0xa0d   :  { %v1165_v9 = vmul.f32 -1.442695, %v812_v3  ;;  %v815_v13 = vadd.f32 %v814_v8, %v1591_v53  ;;  %v1301_v14 = vpop.f32.mrb[27].mxu1 }
 0xa0f   :  { %1388 = vpow2.f32 %v1165_v9  ;;  %v1166_v16 = vmul.f32 -1.442695, %v815_v13 }
 0xa11   :  { %1390 = vpow2.f32 %v1166_v16 }
 0xa12   :  { %v918_v28 = vpop.f32.mrb[28].mxu1 }
 0xa13   :  { %v1312_v39 = vpop.f32.mrb[29].mxu1 }
 0xa14   :  { %v921_v40 = vpop.f32.mrb[30].mxu1 }
 0xa19   :  { %v1389_v17 = vpop.eup %1388 }
 0xa1a   :  { %v824_v18 = vadd.f32 1.0, %v1389_v17 }
 0xa1b   :  { %v1391_v19 = vpop.eup %1390 }
 0xa1c   :  { %v825_v20 = vadd.f32 1.0, %v1391_v19  ;;  %1392 = vrcp.f32 %v824_v18 }
 0xa1e   :  { %1394 = vrcp.f32 %v825_v20 }
 0xa26   :  { %v1393_v22 = vpop.eup %1392 }
 0xa28   :  { %v1395_v23 = vpop.eup %1394 }
 0xa29   :  { %v830_v1 = vpack.c.bf16 %v1395_v23, %v1393_v22 }
 0xa2b   :  { %1303 = vmatpush3.bf16.msra.mxu0 %v830_v1 }
 0xa2c   :  { %1314 = vmatprep.subr.bf16.mxu0 %v1436_v2 }
 0xa2e   :  { %1305 = vmatmul.mubr.msk.bf16.vlgmr.msra.gmra.mrb[28].mxu0 %vm199_vm5, %v1597_v4 }
 0xa2f   :  { %1316 = vmatprep.mubr.msk.bf16.mxu0 %vm1437_vm2, %v1436_v2 }
 0xb01   :  { %v865_v27 = vpop.f32.mrb[28].mxu0 }
 0xb02   :  { %v866_v29 = vadd.f32 %v865_v27, %v1618_v11  ;;  %v1306_v32 = vpop.f32.mrb[29].mxu0 }
 0xb03   :  { %v868_v21 = vpop.f32.mrb[30].mxu0 }
 0xb04   :  { %871 = vst [vmem:[#allocation3 + $0x2] sm:$0x1] %v866_v29  ;;  %v876_v34 = vrot.slane %v866_v29, %v1621_v12  ;;  %v1307_v36 = vpop.f32.mrb[31].mxu0  ;;  %v1313_v12 = vpop.f32.mrb[31].mxu1 }
 0xb06   :  { %v877_v37 = vsel %vm60_vm6, %v876_v34, %v872_v33 }
 0xb07   :  { %v880_v38 = vpack.c.bf16 %v877_v37, %v877_v37 }
 0xb09   :  { %v926_v5 = vsel %vm126_vm1, %v880_v38, 0 }
 0xb0a   :  { %1315 = vmatpush3.bf16.msra.mxu0 %v926_v5 }
 0xb0b   :  { %1326 = vmatprep.subr.bf16.mxu0 %v1436_v2 }
 0xb0d   :  { %1317 = vmatmul.mubr.msk.bf16.vlgmr.msra.gmra.mrb[32].mxu0 %vm122_vm4, %v1526_v7 }
 0xb0e   :  { %1328 = vmatprep.mubr.msk.bf16.mxu0 %vm1437_vm2, %v1436_v2 }
 0xbe0   :  { %v962_v41 = vpop.f32.mrb[32].mxu0 }
 0xbe1   :  { %v963_v42 = vadd.f32 %v962_v41, %v918_v28  ;;  %v1318_v10 = vpop.f32.mrb[33].mxu0 }
 0xbe2   :  { %v965_v43 = vpop.f32.mrb[34].mxu0 }
 0xbe3   :  { %v966_v44 = vadd.f32 %v965_v43, %v921_v40  ;;  %v1319_v45 = vpop.f32.mrb[35].mxu0  ;;  %v969_v46 = vadd.f32 %v963_v42, %v1556_v15 }
 0xbe5   :  { %v970_v47 = vadd.f32 %v966_v44, %v1558_v26 }
 0xbe7   :  { %v971_v50 = vpack.c.bf16 %v970_v47, %v969_v46 }
 0xbe9   :  { %1321 = vmatpush3.bf16.msra.mxu1 %v971_v50 }
 0xbea   :  { %1332 = vmatprep.subr.bf16.mxu1 %v1436_v2 }
 0xbec   :  { %1323 = vmatmul.mubr.msk.bf16.vlgmr.msra.gmra.mrb[32].mxu1 %vm199_vm5, %v1565_v30 }
 0xbed   :  { %1334 = vmatprep.mubr.msk.bf16.mxu1 %vm1437_vm2, %v1436_v2 }
 0xcbf   :  { %v1006_v7 = vpop.f32.mrb[32].mxu1 }
 0xcc0   :  { %v1007_v51 = vadd.f32 %v1006_v7, %v1572_v31  ;;  %v1324_v52 = vpop.f32.mrb[33].mxu1 }
 0xcc1   :  { %v1009_v54 = vpop.f32.mrb[34].mxu1 }
 0xcc2   :  { %v1172_v55 = vmul.f32 -1.442695, %v1007_v51  ;;  %v1010_v15 = vadd.f32 %v1009_v54, %v1575_v35  ;;  %v1325_v56 = vpop.f32.mrb[35].mxu1 }
 0xcc4   :  { %1396 = vpow2.f32 %v1172_v55  ;;  %v1173_v26 = vmul.f32 -1.442695, %v1010_v15 }
 0xcc6   :  { %1398 = vpow2.f32 %v1173_v26 }
 0xcce   :  { %v1397_v57 = vpop.eup %1396 }
 0xccf   :  { %v1019_v58 = vadd.f32 1.0, %v1397_v57 }
 0xcd0   :  { %v1399_v59 = vpop.eup %1398 }
 0xcd1   :  { %v1020_v60 = vadd.f32 1.0, %v1399_v59  ;;  %1400 = vrcp.f32 %v1019_v58 }
 0xcd3   :  { %1402 = vrcp.f32 %v1020_v60 }
 0xcdb   :  { %v1401_v30 = vpop.eup %1400 }
 0xcdd   :  { %v1403_v2 = vpop.eup %1402 }
 0xcde   :  { %v1025_v61 = vpack.c.bf16 %v1403_v2, %v1401_v30 }
 0xce0   :  { %1327 = vmatpush3.bf16.msra.mxu0 %v1025_v61 }
 0xce3   :  { %1329 = vmatmul.mubr.msk.bf16.vlgmr.msra.gmra.mrb[36].mxu0 %vm199_vm5, %v1581_v48 }
 0xdb6   :  { %v1060_v31 = vpop.f32.mrb[36].mxu0 }
 0xdb7   :  { %v1061_v35 = vadd.f32 %v1060_v31, %v1588_v49  ;;  %v1330_v62 = vpop.f32.mrb[37].mxu0 }
 0xdb8   :  { %v1063_v63 = vpop.f32.mrb[38].mxu0 }
 0xdb9   :  { %v1175_v0 = vmul.f32 -1.442695, %v1061_v35  ;;  %v1064_v3 = vadd.f32 %v1063_v63, %v1591_v53  ;;  %v1331_v6 = vpop.f32.mrb[39].mxu0 }
 0xdbb   :  { %1404 = vpow2.f32 %v1175_v0  ;;  %v1176_v8 = vmul.f32 -1.442695, %v1064_v3 }
 0xdbd   :  { %1406 = vpow2.f32 %v1176_v8 }
 0xdc5   :  { %v1405_v9 = vpop.eup %1404 }
 0xdc6   :  { %v1073_v13 = vadd.f32 1.0, %v1405_v9 }
 0xdc7   :  { %v1407_v14 = vpop.eup %1406 }
 0xdc8   :  { %v1074_v16 = vadd.f32 1.0, %v1407_v14  ;;  %1408 = vrcp.f32 %v1073_v13 }
 0xdca   :  { %1410 = vrcp.f32 %v1074_v16 }
 0xdd2   :  { %v1409_v17 = vpop.eup %1408 }
 0xdd4   :  { %v1411_v48 = vpop.eup %1410 }
 0xdd5   :  { %v1079_v18 = vpack.c.bf16 %v1411_v48, %v1409_v17 }
 0xdd7   :  { %1333 = vmatpush3.bf16.msra.mxu1 %v1079_v18 }
 0xdda   :  { %1335 = vmatmul.mubr.msk.bf16.vlgmr.msra.gmra.mrb[36].mxu1 %vm199_vm5, %v1597_v4 }
 0xead   :  { %v1114_v49 = vpop.f32.mrb[36].mxu1 }
 0xeae   :  { %v1115_v53 = vadd.f32 %v1114_v49, %v1618_v11  ;;  %v1336_v19 = vpop.f32.mrb[37].mxu1 }
 0xeaf   :  { %v1117_v20 = vpop.f32.mrb[38].mxu1 }
 0xeb0   :  { %1120 = vst [vmem:[#allocation3 + $0x3] sm:$0x1] %v1115_v53  ;;  %v1337_v22 = vpop.f32.mrb[39].mxu1 }
 0xeb1   :  { %1423 = shalt.err (!%p1420_p4)
}
 0xeb2   :  { %s1424_s25 = scalar_lea.hbm %s1764_s11, 64 }
 0xeb3   :  { %p1425_p5 = scmp.ne.s32.totalorder %s1764_s11, %s1424_s25  ;;  %p1428_p6 = scmp.lt.u32.totalorder %s1424_s25, %s1764_s11 }
 0xeb5   :  { %p1430_p7 = pnand %p1428_p6, %p1425_p5 }
 0xeb7   :  { %1433 = shalt.err (!%p1430_p7)
}
 0xeb8   :  { %1130 = dma.vmem_to_hbm [thread:$0]  %s1128_s22, 64, %s1764_s11, [#allocation4]  }
 0xeb9   :  { %1434 = dma.done.wait [#allocation4], 64  }
 0xeba   :  { %1435 = vsyncadd [#allocation4], 4294967232 }
 0xebb   :  { %1134 = vsyncpa [#allocation4], 1 }

</bundles_post_ra>
